<compile_context>
chip_gen: v5e
topology: v5e:2x2
jax: 0.10.0
libtpu: 0.0.40
codegen_flags: <defaults>
</compile_context>

<pallas_src>
import jax
import jax.numpy as jnp
from jax.experimental import pallas as pl
from jax.experimental.pallas import tpu as pltpu

GAMMA = 1e-10
_LANES = 128


def _round_up(x: int, m: int) -> int:
    return ((x + m - 1) // m) * m


def _make_bpr_kernel(block_rows: int, n_inner: int, full_blocks: int,
                     remaining_rows: int, has_partial: bool):
    """Build the kernel with all shape/grid facts baked in as constants."""

    def _accumulate(out_ref, loss):
        # Fold (block_rows, 128) -> (8, 128) with pure VPU adds (the reshape
        # splits only the sublane dim, so it stays tile-aligned); the single
        # tiny cross-lane reduce happens in the wrapper.
        out_ref[...] += loss.reshape(block_rows // 8, 8, _LANES).sum(axis=0)

    def _loss_tile(p_ref, n_ref):
        diff = p_ref[...].astype(jnp.float32) - n_ref[...].astype(jnp.float32)
        # sigmoid(x) = 0.5*tanh(0.5*x) + 0.5 : one EUP op instead of exp+recip.
        sig = 0.5 * jnp.tanh(0.5 * diff) + 0.5
        return -jnp.log(GAMMA + sig)

    def kernel(p_ref, n_ref, out_ref):
        i = pl.program_id(1)

        @pl.when(i == 0)
        def _():
            out_ref[...] = jnp.zeros_like(out_ref)

        if not has_partial:
            # Every block is fully valid: pure hot path, no mask, no branch.
            _accumulate(out_ref, _loss_tile(p_ref, n_ref))
            return

        blk = pl.program_id(0) * n_inner + i

        if full_blocks > 0:
            # Interior (fully valid) blocks: unmasked accumulate.
            @pl.when(blk < full_blocks)
            def _():
                _accumulate(out_ref, _loss_tile(p_ref, n_ref))

        # Boundary block: only the first `remaining_rows` rows are real data
        # (the rest of the block window is Pallas boundary padding / garbage).
        @pl.when(blk == full_blocks)
        def _():
            loss = _loss_tile(p_ref, n_ref)
            row = jax.lax.broadcasted_iota(jnp.int32, (block_rows, _LANES), 0)
            loss = jnp.where(row < remaining_rows, loss, 0.0)
            _accumulate(out_ref, loss)

    return kernel


def bpr_loss(p_score: jax.Array, n_score: jax.Array,
             *, block_rows: int = 2048) -> jax.Array:
    """Mean BPR loss via a Pallas TPU kernel. Accepts arbitrary matching shapes."""
    assert p_score.shape == n_score.shape
    n_elems = p_score.size
    if n_elems == 0:
        # torch.mean of an empty tensor is NaN.
        return jnp.float32(float("nan"))

    flat_p = p_score.reshape(-1)
    flat_n = n_score.reshape(-1)

    rows = n_elems // _LANES
    tail = n_elems - rows * _LANES

    # Fold the <128-element ragged tail with a tiny plain-JAX sum (no full
    # array pad copy); 128-aligned sizes reshape for free below.
    if tail:
        tp = flat_p[rows * _LANES:].astype(jnp.float32)
        tn = flat_n[rows * _LANES:].astype(jnp.float32)
        tail_sum = jnp.sum(-jnp.log(GAMMA + jax.nn.sigmoid(tp - tn)))
    else:
        tail_sum = jnp.float32(0.0)

    if rows == 0:
        return (tail_sum / jnp.float32(n_elems)).astype(jnp.float32)

    bulk = rows * _LANES
    p2 = (flat_p[:bulk] if tail else flat_p).reshape(rows, _LANES)
    n2 = (flat_n[:bulk] if tail else flat_n).reshape(rows, _LANES)

    # Tile rows: multiple of 16 (safe for bf16 packing), sized to amortize the
    # ~0.35us per-grid-step overhead while staying a few MiB in VMEM.
    br = _round_up(min(block_rows, max(rows, 1)), 16)
    br = min(br, 4096)

    total_blocks = pl.cdiv(rows, br)
    full_blocks = rows // br
    has_partial = (rows % br) != 0
    remaining_rows = rows - full_blocks * br  # valid rows in the boundary block

    # 2-way outer split only when it divides cleanly: no phantom blocks (no
    # wasted DMA/compute, no mask on interior blocks). Engages both TCs on
    # megacore chips; on single-TC chips it is just a reordered serial loop.
    if total_blocks >= 2 and total_blocks % 2 == 0:
        n_outer, n_inner = 2, total_blocks // 2
    else:
        n_outer, n_inner = 1, total_blocks

    kernel = _make_bpr_kernel(br, n_inner, full_blocks, remaining_rows,
                              has_partial)

    def in_map(o, i):
        return (o * n_inner + i, 0)

    partials = pl.pallas_call(
        kernel,
        out_shape=jax.ShapeDtypeStruct((n_outer, 8, _LANES), jnp.float32),
        grid_spec=pltpu.PrefetchScalarGridSpec(
            num_scalar_prefetch=0,
            grid=(n_outer, n_inner),
            in_specs=[
                pl.BlockSpec((br, _LANES), in_map),
                pl.BlockSpec((br, _LANES), in_map),
            ],
            out_specs=pl.BlockSpec((None, 8, _LANES), lambda o, i: (o, 0, 0)),
        ),
        compiler_params=pltpu.CompilerParams(
            dimension_semantics=("parallel", "arbitrary"),
            vmem_limit_bytes=32 * 1024 * 1024),
    )(p2, n2)

    # Tiny final reduce (n_outer*8*128 lane partials + tail) + mean, plain JAX.
    # NOTE: per-lane f32 partial sums can drift at ~1e-5 only for >1e8-element
    # inputs; acceptable for a mean loss.
    total = jnp.sum(partials) + tail_sum
    return (total / jnp.float32(n_elems)).astype(jnp.float32)


def bpr_loss_ref(p_score, n_score):
    return jnp.mean(-jnp.log(GAMMA + jax.nn.sigmoid(
        p_score.astype(jnp.float32) - n_score.astype(jnp.float32))))


if __name__ == "__main__":
    key = jax.random.PRNGKey(0)
    kp, kn = jax.random.split(key)

    # Case 1: module-scale shape (batch=8, 32 negatives), f32.
    # Exercises: single partial block, masked boundary path, n_outer=1.
    shape = (8, 32)
    p_score = jax.random.normal(kp, shape, dtype=jnp.float32)
    n_score = jax.random.normal(kn, shape, dtype=jnp.float32)
    out = jax.block_until_ready(bpr_loss(p_score, n_score))
    ref = bpr_loss_ref(p_score, n_score)
    assert jnp.allclose(out, ref, rtol=1e-5, atol=1e-6), (out, ref)

    # Case 2: ragged total + bf16 inputs.
    # Exercises: plain-JAX tail fold, guarded interior blocks, masked boundary.
    shape2 = (40, 127)
    p2 = jax.random.normal(kp, shape2, dtype=jnp.bfloat16)
    n2 = jax.random.normal(kn, shape2, dtype=jnp.bfloat16)
    out2 = jax.block_until_ready(bpr_loss(p2, n2, block_rows=16))
    ref2 = bpr_loss_ref(p2, n2)
    assert jnp.allclose(out2, ref2, rtol=1e-4, atol=1e-5), (out2, ref2)

    # Case 3: clean multi-block grid.
    # Exercises: 2-way parallel outer axis, pure unmasked hot path,
    # multiple resident accumulators.
    shape3 = (128, 256)
    p3 = jax.random.normal(kp, shape3, dtype=jnp.float32)
    n3 = jax.random.normal(kn, shape3, dtype=jnp.float32)
    out3 = jax.block_until_ready(bpr_loss(p3, n3, block_rows=64))
    ref3 = bpr_loss_ref(p3, n3)
    assert jnp.allclose(out3, ref3, rtol=1e-5, atol=1e-6), (out3, ref3)

    print("KERNEL_OK")
</pallas_src>

<mosaic_0001>
module attributes {stable_mosaic.version = 11 : i64} {
  func.func @kernel(%arg0: i32, %arg1: i32, %arg2: memref<16x128xf32, #tpu.memory_space<vmem>>, %arg3: memref<16x128xf32, #tpu.memory_space<vmem>>, %arg4: memref<1x8x128xf32, #tpu.memory_space<vmem>>) attributes {dimension_semantics = [#tpu.dimension_semantics<parallel>, #tpu.dimension_semantics<arbitrary>], iteration_bounds = array<i64: 1, 1>, scalar_prefetch = 0 : i64, scratch_operands = 0 : i64, tpu.core_type = #tpu.core_type<tc>, window_params = [{transform_indices = @transform_0, window_bounds = array<i64: 16, 128>}, {transform_indices = @transform_1, window_bounds = array<i64: 16, 128>}, {transform_indices = @transform_2, window_bounds = array<i64: 1, 8, 128>}]} {
    %c0_i32 = arith.constant 0 : i32
    %0 = arith.cmpi eq, %arg1, %c0_i32 : i32
    %1 = arith.extui %0 : i1 to i32
    %c0_i32_0 = arith.constant 0 : i32
    %2 = arith.cmpi ne, %1, %c0_i32_0 : i32
    scf.if %2 {
      %cst = arith.constant 0.000000e+00 : f32
      %8 = vector.broadcast %cst : f32 to vector<8x128xf32>
      %c0 = arith.constant 0 : index
      %c0_3 = arith.constant 0 : index
      %c0_4 = arith.constant 0 : index
      %9 = vector.load %arg4[%c0, %c0_3, %c0_4] : memref<1x8x128xf32, #tpu.memory_space<vmem>>, vector<1x8x128xf32>
      %10 = vector.shape_cast %9 : vector<1x8x128xf32> to vector<8x128xf32>
      %11 = vector.shape_cast %8 : vector<8x128xf32> to vector<1x8x128xf32>
      tpu.vector_store %arg4[%c0, %c0_3, %c0_4], %11 {strides = array<i32>} : memref<1x8x128xf32, #tpu.memory_space<vmem>>, vector<1x8x128xf32>,
    } else {
    }
    %c1_i32 = arith.constant 1 : i32
    %3 = arith.muli %arg0, %c1_i32 : i32
    %4 = arith.addi %3, %arg1 : i32
    %c0_i32_1 = arith.constant 0 : i32
    %5 = arith.cmpi eq, %4, %c0_i32_1 : i32
    %6 = arith.extui %5 : i1 to i32
    %c0_i32_2 = arith.constant 0 : i32
    %7 = arith.cmpi ne, %6, %c0_i32_2 : i32
    scf.if %7 {
      %c0 = arith.constant 0 : index
      %c0_3 = arith.constant 0 : index
      %8 = vector.load %arg2[%c0, %c0_3] : memref<16x128xf32, #tpu.memory_space<vmem>>, vector<16x128xf32>
      %c0_4 = arith.constant 0 : index
      %c0_5 = arith.constant 0 : index
      %9 = vector.load %arg3[%c0_4, %c0_5] : memref<16x128xf32, #tpu.memory_space<vmem>>, vector<16x128xf32>
      %10 = arith.subf %8, %9 : vector<16x128xf32>
      %cst = arith.constant 5.000000e-01 : f32
      %11 = vector.broadcast %cst : f32 to vector<16x128xf32>
      %12 = arith.mulf %11, %10 : vector<16x128xf32>
      %13 = math.tanh %12 : vector<16x128xf32>
      %cst_6 = arith.constant 5.000000e-01 : f32
      %14 = vector.broadcast %cst_6 : f32 to vector<16x128xf32>
      %15 = arith.mulf %14, %13 : vector<16x128xf32>
      %cst_7 = arith.constant 5.000000e-01 : f32
      %16 = vector.broadcast %cst_7 : f32 to vector<16x128xf32>
      %17 = arith.addf %15, %16 : vector<16x128xf32>
      %cst_8 = arith.constant 1.000000e-10 : f32
      %18 = vector.broadcast %cst_8 : f32 to vector<16x128xf32>
      %19 = arith.addf %18, %17 : vector<16x128xf32>
      %20 = math.log %19 : vector<16x128xf32>
      %cst_9 = arith.constant 0.000000e+00 : f32
      %21 = vector.broadcast %cst_9 : f32 to vector<16x128xf32>
      %22 = arith.subf %21, %20 : vector<16x128xf32>
      %23 = tpu.iota {dimensions = array<i32: 0>} : vector<16x128xi32>
      %c2_i32 = arith.constant 2 : i32
      %24 = vector.broadcast %c2_i32 : i32 to vector<16x128xi32>
      %25 = arith.cmpi slt, %23, %24 : vector<16x128xi32>
      %cst_10 = arith.constant 0.000000e+00 : f32
      %26 = vector.broadcast %cst_10 : f32 to vector<16x128xf32>
      %27 = arith.select %25, %22, %26 : vector<16x128xi1>, vector<16x128xf32>
      %c0_11 = arith.constant 0 : index
      %c0_12 = arith.constant 0 : index
      %c0_13 = arith.constant 0 : index
      %28 = vector.load %arg4[%c0_11, %c0_12, %c0_13] : memref<1x8x128xf32, #tpu.memory_space<vmem>>, vector<1x8x128xf32>
      %29 = vector.shape_cast %28 : vector<1x8x128xf32> to vector<8x128xf32>
      %30 = vector.shape_cast %27 : vector<16x128xf32> to vector<2x8x128xf32>
      %cst_14 = arith.constant dense<0.000000e+00> : vector<8x128xf32>
      %31 = vector.multi_reduction <add>, %30, %cst_14 [0] : vector<2x8x128xf32> to vector<8x128xf32>
      %32 = arith.addf %29, %31 : vector<8x128xf32>
      %c0_15 = arith.constant 0 : index
      %c0_16 = arith.constant 0 : index
      %c0_17 = arith.constant 0 : index
      %33 = vector.load %arg4[%c0_15, %c0_16, %c0_17] : memref<1x8x128xf32, #tpu.memory_space<vmem>>, vector<1x8x128xf32>
      %34 = vector.shape_cast %33 : vector<1x8x128xf32> to vector<8x128xf32>
      %35 = vector.shape_cast %32 : vector<8x128xf32> to vector<1x8x128xf32>
      tpu.vector_store %arg4[%c0_15, %c0_16, %c0_17], %35 {strides = array<i32>} : memref<1x8x128xf32, #tpu.memory_space<vmem>>, vector<1x8x128xf32>,
    } else {
    }
    return
  }
  func.func @transform_0(%arg0: i32, %arg1: i32) -> (i32, i32) {
    %c1_i32 = arith.constant 1 : i32
    %0 = arith.muli %arg0, %c1_i32 : i32
    %1 = arith.addi %0, %arg1 : i32
    %c0_i32 = arith.constant 0 : i32
    %c0_i32_0 = arith.constant 0 : i32
    return %1, %c0_i32 : i32, i32
  }
  func.func @transform_1(%arg0: i32, %arg1: i32) -> (i32, i32) {
    %c1_i32 = arith.constant 1 : i32
    %0 = arith.muli %arg0, %c1_i32 : i32
    %1 = arith.addi %0, %arg1 : i32
    %c0_i32 = arith.constant 0 : i32
    %c0_i32_0 = arith.constant 0 : i32
    return %1, %c0_i32 : i32, i32
  }
  func.func @transform_2(%arg0: i32, %arg1: i32) -> (i32, i32, i32) {
    %c0_i32 = arith.constant 0 : i32
    %c0_i32_0 = arith.constant 0 : i32
    %c0_i32_1 = arith.constant 0 : i32
    return %arg0, %c0_i32, %c0_i32_0 : i32, i32, i32
  }
}

</mosaic_0001>

<bundles_post_ra>
// kernel: tpu_custom_call.1
= control target key start
LH: loop header
LB: loop body
LE: loop exit
PB: predicated region body
PF: predicated region fallthrough
CT: control target
= control target key end

     0   :  { %7 = vsyncpa [#allocation3], 0  ;;  %s248_s0 = inlined_call_operand.hbm [shape: f32[2,128], index: 0, kind: input, shape index: {}]   ;;  %s249_s1 = inlined_call_operand.hbm [shape: f32[2,128], index: 1, kind: input, shape index: {}]   ;;  %s250_s2 = inlined_call_operand.hbm [shape: f32[1,8,128], index: 2, kind: output, shape index: {}]  }
   0x1   :  { %8 = vsyncpa [#allocation6], 0 }
   0x2   :  { %9 = vsyncpa [#allocation4], 0 }
   0x3   :  { %18 = vsyncadd [#allocation3], 224  ;;  %s23_s11 = sshll.u32 %s248_s0, 4  ;;  %s219_s12 = smov [#allocation2]   ;;  %s24_s11 = int_to_ptr.hbm [resolvable:$true] %s23_s11 }
   0x4   :  { %s25_s13 = sshll.u32 %s219_s12, 4  ;;  %s220_s14 = smov 32   ;;  %s26_s13 = int_to_ptr.vmem [resolvable:$true] %s25_s13 }
   0x5   :  { %s221_s15 = smov 2  }
   0x6   :  { %31 = dma.hbm_to_vmem [thread:$0]  %s24_s11, 32, %s26_s13, [#allocation3], %s220_s14, %s220_s14, %s221_s15  }
   0x7   :  { %40 = vsyncadd [#allocation6], 224  ;;  %s45_s18 = sshll.u32 %s249_s1, 4  ;;  %s222_s19 = smov [#allocation5]   ;;  %s46_s18 = int_to_ptr.hbm [resolvable:$true] %s45_s18 }
   0x8   :  { %s47_s20 = sshll.u32 %s222_s19, 4  ;;  %s48_s20 = int_to_ptr.vmem [resolvable:$true] %s47_s20 }
   0x9   :  { %53 = dma.hbm_to_vmem [thread:$0]  %s46_s18, 32, %s48_s20, [#allocation6], %s220_s14, %s220_s14, %s221_s15  }
   0xa   :  { %213 = dma.done.wait [#allocation3], 256  }
   0xb   :  { %214 = vsyncadd [#allocation3], 4294967040 }
   0xc   :  { %215 = dma.done.wait [#allocation6], 256  }
   0xd   :  { %216 = vsyncadd [#allocation6], 4294967040  ;;  %v80_v0 = vld [vmem:[#allocation2] sm:$0xff]  ;;  %v82_v1 = vld [vmem:[#allocation5] sm:$0xff]  ;;  %v102_v8 = vlaneseq  ;;  %s223_s0 = smov [#allocation7]   ;;  %s120_s23 = sshll.u32 %s250_s2, 4  ;;  %s121_s23 = int_to_ptr.hbm [resolvable:$true] %s120_s23 }
   0xe   :  { %v84_v2 = vsub.f32 %v80_v0, %v82_v1  ;;  %s118_s1 = sshll.u32 %s223_s0, 4  ;;  %s119_s1 = int_to_ptr.vmem [resolvable:$true] %s118_s1 }
   0xf   :  { %v103_v9 = vshrl.u32 %v102_v8, 7 }
  0x10   :  { %v86_v3 = vmul.f32 0.5, %v84_v2 }
  0x11   :  { %vm105_vm0 = vcmp.lt.s32.totalorder %v103_v9, 2 }
  0x12   :  { %137 = vtanh.f32 %v86_v3 }
  0x18   :  { %v138_v4 = vpop.eup %137 }
  0x19   :  { %v90_v5 = vmul.f32 0.5, %v138_v4 }
  0x1b   :  { %v92_v6 = vadd.f32 0.5, %v90_v5 }
  0x1d   :  { %v94_v7 = vadd.f32 1e-10, %v92_v6 }
  0x1f   :  { %139 = vlog2.f32 %v94_v7 }
  0x25   :  { %v140_v10 = vpop.eup %139 }
  0x26   :  { %v97_v11 = vmul.f32 0.6931472, %v140_v10 }
  0x28   :  { %v100_v12 = vsub.f32 0.0, %v97_v11 }
  0x2a   :  { %v107_v13 = vsel %vm105_vm0, %v100_v12, 0.0 }
  0x2b   :  { %112 = vst [vmem:[#allocation7] sm:$0xff] %v107_v13 }
  0x2c   :  { %123 = dma.vmem_to_hbm [thread:$0]  %s119_s1, 128, %s121_s23, [#allocation4]  }
  0x2d   :  { %217 = dma.done.wait [#allocation4], 128  }
  0x2e   :  { %218 = vsyncadd [#allocation4], 4294967168 }
  0x2f   :  { %128 = vsyncpa [#allocation3], 1 }
  0x30   :  { %129 = vsyncpa [#allocation6], 1 }
  0x31   :  { %130 = vsyncpa [#allocation4], 1 }

</bundles_post_ra>
